<compile_context>
chip_gen: v5e
topology: v5e:2x2
jax: 0.10.0
libtpu: 0.0.40
codegen_flags: <defaults>
</compile_context>

<pallas_src>
import jax
import jax.numpy as jnp
from jax.experimental import pallas as pl
from jax.experimental.pallas import tpu as pltpu

_LANE = 128
_SUBLANE = 8


def _copy_kernel(src_ref, dst_ref):
    # Pure pass-through: the abstract Decoder defines no transformation.
    dst_ref[...] = src_ref[...]


def _pick_row_tile(num_rows, row_bytes, target_bytes):
    """Largest row tile that divides num_rows, is a multiple of 8 (sublane),
    and keeps one block <= target_bytes. Falls back to the full extent."""
    max_rows = max(1, target_bytes // max(1, row_bytes))
    if num_rows <= max_rows:
        return num_rows
    t = (max_rows // _SUBLANE) * _SUBLANE
    while t >= _SUBLANE:
        if num_rows % t == 0:
            return t
        t -= _SUBLANE
    return num_rows  # no clean divisor: single full block


def _identity_copy(arr, *, target_block_bytes=2 << 20):
    """Identity copy of `arr` through VMEM, lane-dense + tiled when possible."""
    total = int(arr.size)
    itemsize = jnp.dtype(arr.dtype).itemsize
    cost = pl.CostEstimate(
        flops=0, transcendentals=0, bytes_accessed=2 * total * itemsize
    )

    if total > 0 and total % _LANE == 0:
        # Lane-dense path: view as [rows, 128] and tile over rows.
        rows = total // _LANE
        flat = arr.reshape(rows, _LANE)
        row_tile = _pick_row_tile(rows, _LANE * itemsize, target_block_bytes)
        grid = (rows // row_tile,)
        out = pl.pallas_call(
            _copy_kernel,
            out_shape=jax.ShapeDtypeStruct((rows, _LANE), arr.dtype),
            grid_spec=pltpu.PrefetchScalarGridSpec(
                num_scalar_prefetch=0,
                grid=grid,
                in_specs=[pl.BlockSpec((row_tile, _LANE), lambda i: (i, 0))],
                out_specs=pl.BlockSpec((row_tile, _LANE), lambda i: (i, 0)),
            ),
            compiler_params=pltpu.CompilerParams(
                dimension_semantics=("parallel",),
            ),
            input_output_aliases={0: 0},
            cost_estimate=cost,
        )(flat)
        return out.reshape(arr.shape)

    # Fallback: small / non-lane-aligned tensor, single full-array block.
    ndim = arr.ndim
    return pl.pallas_call(
        _copy_kernel,
        out_shape=jax.ShapeDtypeStruct(arr.shape, arr.dtype),
        grid_spec=pltpu.PrefetchScalarGridSpec(
            num_scalar_prefetch=0,
            grid=(1,),
            in_specs=[pl.BlockSpec(arr.shape, lambda i: (0,) * ndim)],
            out_specs=pl.BlockSpec(arr.shape, lambda i: (0,) * ndim),
        ),
        compiler_params=pltpu.CompilerParams(
            dimension_semantics=("arbitrary",),
        ),
        input_output_aliases={0: 0},
        cost_estimate=cost,
    )(arr)


def decoder_forward(x, state):
    """Pass-through "forward" of the abstract Decoder, run as Pallas kernels.

    x:     [B, S, H]  (batch, seq, hidden)
    state: [B, H]
    Returns (x, state) unchanged (identity), copied on-chip through VMEM.
    """
    x_out = _identity_copy(x)
    state_out = _identity_copy(state)
    return x_out, state_out


def init_state(encoded_state):
    # Abstract in the reference module (raises NotImplementedError).
    # TODO(synk): no concrete init_state semantics defined in the base class.
    return encoded_state


if __name__ == "__main__":
    key = jax.random.PRNGKey(0)
    kx, ks = jax.random.split(key)

    B, S, H = 2, 8, 32  # small shapes consistent with a seq2seq decoder input
    x = jax.random.normal(kx, (B, S, H), dtype=jnp.float32)
    encoded_state = jax.random.normal(ks, (B, H), dtype=jnp.float32)

    state = init_state(encoded_state)
    x_out, state_out = decoder_forward(x, state)
    jax.block_until_ready((x_out, state_out))

    # Sanity check: abstract forward contributes no transformation.
    assert x_out.shape == x.shape and x_out.dtype == x.dtype
    assert state_out.shape == state.shape and state_out.dtype == state.dtype
    assert jnp.allclose(x_out, x)
    assert jnp.allclose(state_out, state)

    print("KERNEL_OK")
</pallas_src>

<mosaic_0001>
module attributes {stable_mosaic.version = 11 : i64} {
  func.func @_copy_kernel(%arg0: i32, %arg1: memref<4x128xf32, #tpu.memory_space<vmem>>, %arg2: memref<4x128xf32, #tpu.memory_space<vmem>>) attributes {dimension_semantics = [#tpu.dimension_semantics<parallel>], iteration_bounds = array<i64: 1>, scalar_prefetch = 0 : i64, scratch_operands = 0 : i64, tpu.core_type = #tpu.core_type<tc>, window_params = [{transform_indices = @transform_0, window_bounds = array<i64: 4, 128>}, {transform_indices = @transform_1, window_bounds = array<i64: 4, 128>}]} {
    %c0 = arith.constant 0 : index
    %c0_0 = arith.constant 0 : index
    %0 = vector.load %arg1[%c0, %c0_0] : memref<4x128xf32, #tpu.memory_space<vmem>>, vector<4x128xf32>
    %c0_1 = arith.constant 0 : index
    %c0_2 = arith.constant 0 : index
    %1 = vector.load %arg2[%c0_1, %c0_2] : memref<4x128xf32, #tpu.memory_space<vmem>>, vector<4x128xf32>
    tpu.vector_store %arg2[%c0_1, %c0_2], %0 {strides = array<i32>} : memref<4x128xf32, #tpu.memory_space<vmem>>, vector<4x128xf32>,
    return
  }
  func.func @transform_0(%arg0: i32) -> (i32, i32) {
    %c0_i32 = arith.constant 0 : i32
    %c0_i32_0 = arith.constant 0 : i32
    return %arg0, %c0_i32 : i32, i32
  }
  func.func @transform_1(%arg0: i32) -> (i32, i32) {
    %c0_i32 = arith.constant 0 : i32
    %c0_i32_0 = arith.constant 0 : i32
    return %arg0, %c0_i32 : i32, i32
  }
}

</mosaic_0001>

<bundles_post_ra>
// kernel: tpu_custom_call.1
= control target key start
LH: loop header
LB: loop body
LE: loop exit
PB: predicated region body
PF: predicated region fallthrough
CT: control target
= control target key end

     0   :  { %6 = vsyncpa [#allocation3], 0  ;;  %s114_s0 = inlined_call_operand.hbm [shape: f32[4,128], index: 0, kind: input, shape index: {}, may-alias: {0,1}]   ;;  %s115_s1 = inlined_call_operand.hbm [shape: f32[4,128], index: 1, kind: output, shape index: {}, may-alias: {0,1}]  }
   0x1   :  { %7 = vsyncpa [#allocation4], 0  ;;  %s13_s8 = sshll.u32 %s114_s0, 4  ;;  %s96_s9 = smov [#allocation2]   ;;  %s14_s8 = int_to_ptr.hbm [resolvable:$true] %s13_s8 }
   0x2   :  { %s15_s10 = sshll.u32 %s96_s9, 4  ;;  %s16_s10 = int_to_ptr.vmem [resolvable:$true] %s15_s10 }
   0x3   :  { %18 = dma.hbm_to_vmem [thread:$0]  %s14_s8, 64, %s16_s10, [#allocation3]  }
   0x4   :  { %92 = dma.done.wait [#allocation3], 64  }
   0x5   :  { %93 = vsyncadd [#allocation3], 4294967232  ;;  %s97_s11 = smov [#allocation5]   ;;  %s32_s15 = sshll.u32 %s115_s1, 4  ;;  %v23_v0 = vld [vmem:[#allocation2] sm:$0xf]  ;;  %s33_s15 = int_to_ptr.hbm [resolvable:$true] %s32_s15 }
   0x6   :  { %s30_s12 = sshll.u32 %s97_s11, 4  ;;  %24 = vst [vmem:[#allocation5] sm:$0xf] %v23_v0  ;;  %s31_s12 = int_to_ptr.vmem [resolvable:$true] %s30_s12 }
   0x7   :  { %35 = dma.vmem_to_hbm [thread:$0]  %s31_s12, 64, %s33_s15, [#allocation4]  }
   0x8   :  { %94 = dma.done.wait [#allocation4], 64  }
   0x9   :  { %95 = vsyncadd [#allocation4], 4294967232 }
   0xa   :  { %40 = vsyncpa [#allocation3], 1 }
   0xb   :  { %41 = vsyncpa [#allocation4], 1 }

</bundles_post_ra>
